<compile_context>
chip_gen: v7x
topology: tpu7x:2x2x1
jax: 0.10.0
libtpu: 0.0.40
codegen_flags: <defaults>
</compile_context>

<pallas_src>
import functools

import numpy as np
import jax
import jax.numpy as jnp
from jax.experimental import pallas as pl
from jax.experimental.pallas import tpu as pltpu


# Fixed Sobel filters from the module __init__ (identical for every channel);
# used only by the pure-JAX reference — the kernel bakes the separable form in.
_SOBEL_X = np.array([[1.0, 0.0, -1.0],
                     [2.0, 0.0, -2.0],
                     [1.0, 0.0, -1.0]], dtype=np.float32)
_SOBEL_Y = _SOBEL_X.T.copy()

# VMEM sizing model (bytes):
#   2 x in block (double-buffered) + 2 x out block (double-buffered)
#   + ~10 live f32 temporaries of block size inside the body.
_LIVE_F32_BUFFERS = 10
_VMEM_WORKING_SET_BYTES = 40 << 20     # target total working set
_VMEM_LIMIT_BYTES = 64 << 20           # explicit scoped-VMEM limit (<= v7x physical)

# Below this many total elements the fixed pallas_call / pipeline-prologue
# overhead dominates; fall back to plain XLA.  The test shape (2,4,16,16)
# stays on the Pallas path.
_XLA_FALLBACK_ELEMS = 1024


def _sobelxy_kernel(m_ref, x_ref, o_ref, *, H, W):
    """One block of TB flattened planes.

    m_ref: (4, H*W) float32 boundary masks [up, down, left, right] (resident).
    x_ref / o_ref: (TB, H*W).
    """
    HW = H * W
    x = x_ref[...].astype(jnp.float32)                     # (TB, HW)

    m = m_ref[...]                                         # (4, HW)
    m_up, m_dn = m[0:1, :], m[1:2, :]                      # reading (i-1,j)/(i+1,j) valid
    m_lf, m_rt = m[2:3, :], m[3:4, :]                      # reading (i,j-1)/(i,j+1) valid

    def rolled(a, k):
        """rolled(a, k)[p] == a[p - k] (mod HW) within each plane (static k).

        Wrapped entries (row/column/plane wrap) are killed by the masks,
        which reproduces the conv's zero padding exactly.
        """
        k = k % HW
        return a if k == 0 else pltpu.roll(a, k, 1)

    x2 = x + x                                             # shared 2*x term

    # Masked 4-neighbourhood of x (each computed once).
    xu = rolled(x, W) * m_up      # x[i-1, j]
    xd = rolled(x, -W) * m_dn     # x[i+1, j]
    xl = rolled(x, 1) * m_lf      # x[i, j-1]
    xr = rolled(x, -1) * m_rt     # x[i, j+1]

    # Separable form of the PyTorch cross-correlation with zero padding:
    #   sobel_x = d/dx of the vertically  [1,2,1]-smoothed image
    #   sobel_y = d/dy of the horizontally [1,2,1]-smoothed image
    v = xu + x2 + xd                                       # [1,2,1] along y
    h = xl + x2 + xr                                       # [1,2,1] along x

    sobelx = rolled(v, 1) * m_lf - rolled(v, -1) * m_rt    # d/dx
    sobely = rolled(h, W) * m_up - rolled(h, -W) * m_dn    # d/dy

    o_ref[...] = (jnp.abs(sobelx) + jnp.abs(sobely)).astype(o_ref.dtype)


def _choose_block_planes(B, HW, in_itemsize, out_itemsize):
    """Planes per grid step under the VMEM working-set budget.

    Keeps the sublane-blocked dim a multiple of 8 whenever B >= 8 and forces
    at least 2 grid steps when B >= 16 so v7x's two TensorCores both get work.
    """
    per_plane = HW * (2 * in_itemsize + 2 * out_itemsize + _LIVE_F32_BUFFERS * 4)
    tb = max(1, _VMEM_WORKING_SET_BYTES // per_plane)
    tb = min(tb, B)
    if B >= 16:                       # guarantee >= 2 grid steps (megacore)
        tb = min(tb, max(8, B // 2))
    if B >= 8:
        tb = max(8, (tb // 8) * 8)    # sublane-aligned; never below one tile
    return int(tb)


def _reference(x):
    """Pure-JAX reference (explicit zero-padded cross-correlation)."""
    N, C, H, W = x.shape
    xp = jnp.pad(x, ((0, 0), (0, 0), (1, 1), (1, 1)))

    def conv(w):
        acc = jnp.zeros_like(x)
        for u in range(3):
            for v in range(3):
                acc = acc + w[u, v] * xp[:, :, u:u + H, v:v + W]
        return acc

    return (jnp.abs(conv(jnp.asarray(_SOBEL_X)))
            + jnp.abs(conv(jnp.asarray(_SOBEL_Y))))


def sobelxy(x):
    """x: (N, C, H, W) -> (N, C, H, W): |sobel_x(x)| + |sobel_y(x)| per plane."""
    N, C, H, W = x.shape
    B = N * C
    HW = H * W

    if B * HW < _XLA_FALLBACK_ELEMS:
        # Sub-vreg amounts of work: kernel-launch overhead dominates.
        return _reference(x)

    xf = x.reshape(B, HW)                         # lane-dense flattened planes

    TB = _choose_block_planes(B, HW, x.dtype.itemsize, x.dtype.itemsize)
    B_pad = ((B + TB - 1) // TB) * TB
    if B_pad != B:
        xf = jnp.pad(xf, ((0, B_pad - B), (0, 0)))
    grid = (B_pad // TB,)

    # Grid-invariant boundary masks, built once outside the kernel.
    pos = jnp.arange(HW, dtype=jnp.int32)
    row = pos // W
    col = pos - row * W
    masks = jnp.stack([row >= 1,            # up-neighbour valid
                       row <= H - 2,        # down-neighbour valid
                       col >= 1,            # left-neighbour valid
                       col <= W - 2],       # right-neighbour valid
                      axis=0).astype(jnp.float32)          # (4, HW)

    out = pl.pallas_call(
        functools.partial(_sobelxy_kernel, H=H, W=W),
        out_shape=jax.ShapeDtypeStruct((B_pad, HW), x.dtype),
        grid=grid,
        in_specs=[
            pl.BlockSpec((4, HW), lambda b: (0, 0)),      # resident masks
            pl.BlockSpec((TB, HW), lambda b: (b, 0)),
        ],
        out_specs=pl.BlockSpec((TB, HW), lambda b: (b, 0)),
        compiler_params=pltpu.CompilerParams(
            dimension_semantics=("parallel",),
            vmem_limit_bytes=_VMEM_LIMIT_BYTES),
    )(masks, xf)

    return out[:B].reshape(N, C, H, W)


if __name__ == "__main__":
    key = jax.random.PRNGKey(0)
    x = jax.random.normal(key, (2, 4, 16, 16), dtype=jnp.float32)

    y = jax.block_until_ready(sobelxy(x))

    y_ref = _reference(x)
    assert y.shape == (2, 4, 16, 16)
    np.testing.assert_allclose(np.asarray(y), np.asarray(y_ref),
                               rtol=1e-5, atol=1e-5)
    print("KERNEL_OK")
</pallas_src>

<mosaic_0001>
module attributes {stable_mosaic.version = 11 : i64} {
  func.func @_sobelxy_kernel(%arg0: i32, %arg1: memref<4x256xf32, #tpu.memory_space<vmem>>, %arg2: memref<8x256xf32, #tpu.memory_space<vmem>>, %arg3: memref<8x256xf32, #tpu.memory_space<vmem>>) attributes {dimension_semantics = [#tpu.dimension_semantics<parallel>], iteration_bounds = array<i64: 1>, scalar_prefetch = 0 : i64, scratch_operands = 0 : i64, tpu.core_type = #tpu.core_type<tc>, window_params = [{pipeline_mode = #tpu.pipeline_mode<synchronous>, transform_indices = @transform_0, window_bounds = array<i64: 4, 256>}, {transform_indices = @transform_1, window_bounds = array<i64: 8, 256>}, {transform_indices = @transform_2, window_bounds = array<i64: 8, 256>}]} {
    %c0 = arith.constant 0 : index
    %c0_0 = arith.constant 0 : index
    %0 = vector.load %arg2[%c0, %c0_0] : memref<8x256xf32, #tpu.memory_space<vmem>>, vector<8x256xf32>
    %c0_1 = arith.constant 0 : index
    %c0_2 = arith.constant 0 : index
    %1 = vector.load %arg1[%c0_1, %c0_2] : memref<4x256xf32, #tpu.memory_space<vmem>>, vector<4x256xf32>
    %2 = vector.extract_strided_slice %1 {offsets = [0, 0], sizes = [1, 256], strides = [1, 1]} : vector<4x256xf32> to vector<1x256xf32>
    %3 = vector.extract_strided_slice %1 {offsets = [1, 0], sizes = [1, 256], strides = [1, 1]} : vector<4x256xf32> to vector<1x256xf32>
    %4 = vector.extract_strided_slice %1 {offsets = [2, 0], sizes = [1, 256], strides = [1, 1]} : vector<4x256xf32> to vector<1x256xf32>
    %5 = vector.extract_strided_slice %1 {offsets = [3, 0], sizes = [1, 256], strides = [1, 1]} : vector<4x256xf32> to vector<1x256xf32>
    %6 = arith.addf %0, %0 : vector<8x256xf32>
    %c16_i32 = arith.constant 16 : i32
    %7 = tpu.dynamic_rotate %0 by %c16_i32 dim 1 : vector<8x256xf32>, i32 -> vector<8x256xf32>
    %8 = vector.broadcast %2 : vector<1x256xf32> to vector<8x256xf32>
    %9 = arith.mulf %7, %8 : vector<8x256xf32>
    %c240_i32 = arith.constant 240 : i32
    %10 = tpu.dynamic_rotate %0 by %c240_i32 dim 1 : vector<8x256xf32>, i32 -> vector<8x256xf32>
    %11 = vector.broadcast %3 : vector<1x256xf32> to vector<8x256xf32>
    %12 = arith.mulf %10, %11 : vector<8x256xf32>
    %c1_i32 = arith.constant 1 : i32
    %13 = tpu.dynamic_rotate %0 by %c1_i32 dim 1 : vector<8x256xf32>, i32 -> vector<8x256xf32>
    %14 = vector.broadcast %4 : vector<1x256xf32> to vector<8x256xf32>
    %15 = arith.mulf %13, %14 : vector<8x256xf32>
    %c255_i32 = arith.constant 255 : i32
    %16 = tpu.dynamic_rotate %0 by %c255_i32 dim 1 : vector<8x256xf32>, i32 -> vector<8x256xf32>
    %17 = vector.broadcast %5 : vector<1x256xf32> to vector<8x256xf32>
    %18 = arith.mulf %16, %17 : vector<8x256xf32>
    %19 = arith.addf %9, %6 : vector<8x256xf32>
    %20 = arith.addf %19, %12 : vector<8x256xf32>
    %21 = arith.addf %15, %6 : vector<8x256xf32>
    %22 = arith.addf %21, %18 : vector<8x256xf32>
    %c1_i32_3 = arith.constant 1 : i32
    %23 = tpu.dynamic_rotate %20 by %c1_i32_3 dim 1 : vector<8x256xf32>, i32 -> vector<8x256xf32>
    %24 = vector.broadcast %4 : vector<1x256xf32> to vector<8x256xf32>
    %25 = arith.mulf %23, %24 : vector<8x256xf32>
    %c255_i32_4 = arith.constant 255 : i32
    %26 = tpu.dynamic_rotate %20 by %c255_i32_4 dim 1 : vector<8x256xf32>, i32 -> vector<8x256xf32>
    %27 = vector.broadcast %5 : vector<1x256xf32> to vector<8x256xf32>
    %28 = arith.mulf %26, %27 : vector<8x256xf32>
    %29 = arith.subf %25, %28 : vector<8x256xf32>
    %c16_i32_5 = arith.constant 16 : i32
    %30 = tpu.dynamic_rotate %22 by %c16_i32_5 dim 1 : vector<8x256xf32>, i32 -> vector<8x256xf32>
    %31 = vector.broadcast %2 : vector<1x256xf32> to vector<8x256xf32>
    %32 = arith.mulf %30, %31 : vector<8x256xf32>
    %c240_i32_6 = arith.constant 240 : i32
    %33 = tpu.dynamic_rotate %22 by %c240_i32_6 dim 1 : vector<8x256xf32>, i32 -> vector<8x256xf32>
    %34 = vector.broadcast %3 : vector<1x256xf32> to vector<8x256xf32>
    %35 = arith.mulf %33, %34 : vector<8x256xf32>
    %36 = arith.subf %32, %35 : vector<8x256xf32>
    %37 = math.absf %29 : vector<8x256xf32>
    %38 = math.absf %36 : vector<8x256xf32>
    %39 = arith.addf %37, %38 : vector<8x256xf32>
    %c0_7 = arith.constant 0 : index
    %c0_8 = arith.constant 0 : index
    %40 = vector.load %arg3[%c0_7, %c0_8] : memref<8x256xf32, #tpu.memory_space<vmem>>, vector<8x256xf32>
    tpu.vector_store %arg3[%c0_7, %c0_8], %39 {strides = array<i32>} : memref<8x256xf32, #tpu.memory_space<vmem>>, vector<8x256xf32>,
    return
  }
  func.func @transform_0(%arg0: i32) -> (i32, i32) {
    %c0_i32 = arith.constant 0 : i32
    %c0_i32_0 = arith.constant 0 : i32
    %c0_i32_1 = arith.constant 0 : i32
    return %c0_i32, %c0_i32_0 : i32, i32
  }
  func.func @transform_1(%arg0: i32) -> (i32, i32) {
    %c0_i32 = arith.constant 0 : i32
    %c0_i32_0 = arith.constant 0 : i32
    return %arg0, %c0_i32 : i32, i32
  }
  func.func @transform_2(%arg0: i32) -> (i32, i32) {
    %c0_i32 = arith.constant 0 : i32
    %c0_i32_0 = arith.constant 0 : i32
    return %arg0, %c0_i32 : i32, i32
  }
}

</mosaic_0001>

<bundles_post_ra>
// kernel: tpu_custom_call.1
= control target key start
LH: loop header
LB: loop body
LE: loop exit
PB: predicated region body
PF: predicated region fallthrough
CT: control target
= control target key end

     0   :  { %7 = vsyncpa [#allocation3], 0  ;;  %s427_s0 = inlined_call_operand.hbm [shape: f32[4,256], index: 0, kind: input, shape index: {}]   ;;  %s428_s1 = inlined_call_operand.hbm [shape: f32[8,256], index: 1, kind: input, shape index: {}]   ;;  %s429_s2 = inlined_call_operand.hbm [shape: f32[8,256], index: 2, kind: output, shape index: {}]  }
   0x1   :  { %8 = vsyncpa [#allocation6], 0 }
   0x2   :  { %9 = vsyncpa [#allocation4], 0  ;;  %s299_s9 = smov [#allocation2]   ;;  %s300_s11 = smov [#allocation5]  }
   0x3   :  { %s16_s10 = sshll.u32 %s299_s9, 4  ;;  %s26_s12 = sshll.u32 %s300_s11, 4  ;;  %s17_s10 = int_to_ptr.vmem [resolvable:$true] %s16_s10  ;;  %s27_s12 = int_to_ptr.vmem [resolvable:$true] %s26_s12 }
   0x4   :  { %s227_s15 = scalar_lea.hbm %s427_s0, 128 }
   0x5   :  { %p228_p0 = scmp.ne.s32.totalorder %s427_s0, %s227_s15  ;;  %p231_p1 = scmp.lt.u32.totalorder %s227_s15, %s427_s0 }
   0x7   :  { %p233_p2 = pnand %p231_p1, %p228_p0 }
   0x9   :  { %236 = shalt.err (!%p233_p2)
}
   0xa   :  { %s237_s20 = scalar_lea.vmem %s17_s10, 128  ;;  %p242_p4 = scmp.lt.s32.totalorder %s17_s10, %s17_s10 }
   0xb   :  { %p238_p3 = scmp.ne.s32.totalorder %s17_s10, %s237_s20  ;;  %p243_p5 = scmp.lt.s32.totalorder %s237_s20, %s237_s20 }
   0xd   :  { %p244_p6 = por %p243_p5, %p242_p4 }
   0xf   :  { %p245_p7 = pnand %p244_p6, %p238_p3 }
  0x11   :  { %248 = shalt.err (!%p245_p7)
}
  0x12   :  { %19 = dma.hbm_to_vmem [thread:$0]  %s427_s0, 128, %s17_s10, [#allocation3]  }
  0x13   :  { %s249_s25 = scalar_lea.hbm %s428_s1, 256 }
  0x14   :  { %p250_p8 = scmp.ne.s32.totalorder %s428_s1, %s249_s25  ;;  %p253_p9 = scmp.lt.u32.totalorder %s249_s25, %s428_s1 }
  0x16   :  { %p255_p10 = pnand %p253_p9, %p250_p8 }
  0x18   :  { %258 = shalt.err (!%p255_p10)
}
  0x19   :  { %s259_s30 = scalar_lea.vmem %s27_s12, 256  ;;  %p264_p12 = scmp.lt.s32.totalorder %s27_s12, %s27_s12 }
  0x1a   :  { %p260_p11 = scmp.ne.s32.totalorder %s27_s12, %s259_s30  ;;  %p265_p13 = scmp.lt.s32.totalorder %s259_s30, %s259_s30 }
  0x1c   :  { %p266_p0 = por %p265_p13, %p264_p12 }
  0x1e   :  { %p267_p1 = pnand %p266_p0, %p260_p11 }
  0x20   :  { %270 = shalt.err (!%p267_p1)
}
  0x21   :  { %29 = dma.hbm_to_vmem [thread:$0]  %s428_s1, 256, %s27_s12, [#allocation6]  }
  0x22   :  { %293 = dma.done.wait [#allocation3], 128  }
  0x23   :  { %294 = vsyncadd [#allocation3], 4294967168 }
  0x24   :  { %295 = dma.done.wait [#allocation6], 256  }
  0x25   :  { %296 = vsyncadd [#allocation6], 4294967040  ;;  %v36_v0 = vld [vmem:[#allocation5] sm:$0xff]  ;;  %s301_s4 = smov 1   ;;  %s302_s5 = smov 16   ;;  %v37_v1 = vld [vmem:[#allocation5 + $0x8] sm:$0xff]  ;;  %v45_v2 = vlaneseq }
  0x26   :  { %98 = vrot.lane.b32.xlu1 %v36_v0, %s301_s4  ;;  %41 = vrot.lane.b32.xlu0 %v36_v0, %s302_s5  ;;  %s303_s6 = smov 112   ;;  %s304_s1 = smov 127   ;;  %v38_v6 = vld [vmem:[#allocation2] sm:$0xff]  ;;  %v40_v20 = vadd.f32 %v37_v1, %v37_v1  ;;  %v39_v27 = vadd.f32 %v36_v0, %v36_v0 }
  0x27   :  { %v52_v3 = vshrl.u32 %v45_v2, 7  ;;  %v353_v7 = vand.u32 127, %v45_v2  ;;  %s305_s7 = smov [#allocation7]  }
  0x28   :  { %s210_s8 = sshll.u32 %s305_s7, 4  ;;  %s211_s8 = int_to_ptr.vmem [resolvable:$true] %s210_s8 }
  0x29   :  { %v53_v4 = vsub.s32 0, %v52_v3  ;;  %v57_v5 = vsub.s32 4, %v52_v3  ;;  %v80_v10 = vsub.s32 1, %v52_v3  ;;  %v84_v11 = vsub.s32 5, %v52_v3  ;;  %s271_s9 = scalar_lea.vmem %s211_s8, 256  ;;  %p276_p3 = scmp.lt.s32.totalorder %s211_s8, %s211_s8 }
  0x2a   :  { %100 = vrot.lane.b32.xlu1 %v37_v1, %s301_s4  ;;  %43 = vrot.lane.b32.xlu0 %v37_v1, %s302_s5  ;;  %v107_v14 = vsub.s32 2, %v52_v3  ;;  %v111_v15 = vsub.s32 6, %v52_v3  ;;  %vm47_vm0 = vcmp.lt.s32.totalorder %v353_v7, 16  ;;  %vm75_vm1 = vcmp.lt.s32.totalorder %v353_v7, 112  ;;  %p272_p2 = scmp.ne.s32.totalorder %s211_s8, %s271_s9  ;;  %p277_p4 = scmp.lt.s32.totalorder %s271_s9, %s271_s9 }
  0x2b   :  { %v54_v8 = vrot.slane %v38_v6, %v53_v4  ;;  %v58_v9 = vrot.slane %v38_v6, %v57_v5  ;;  %v81_v18 = vrot.slane %v38_v6, %v80_v10  ;;  %v85_v19 = vrot.slane %v38_v6, %v84_v11 }
  0x2c   :  { %v108_v21 = vrot.slane %v38_v6, %v107_v14  ;;  %v134_v24 = vsub.s32 3, %v52_v3  ;;  %v138_v25 = vsub.s32 7, %v52_v3  ;;  %v112_v26 = vrot.slane %v38_v6, %v111_v15  ;;  %p278_p5 = por %p277_p4, %p276_p3 }
  0x2d   :  { %v356_v16 = vrot.slane %v54_v8, %v53_v4  ;;  %v358_v17 = vrot.slane %v58_v9, %v53_v4  ;;  %v367_v32 = vrot.slane %v81_v18, %v80_v10  ;;  %v369_v33 = vrot.slane %v85_v19, %v80_v10 }
  0x2e   :  { %73 = vrot.lane.b32.xlu1 %v37_v1, %s303_s6  ;;  %71 = vrot.lane.b32.xlu0 %v36_v0, %s303_s6  ;;  %vm102_vm2 = vcmp.lt.s32.totalorder %v353_v7, 1  ;;  %vm129_vm3 = vcmp.lt.s32.totalorder %v353_v7, 127  ;;  %v135_v36 = vrot.slane %v38_v6, %v134_v24  ;;  %v139_v37 = vrot.slane %v38_v6, %v138_v25  ;;  %p279_p6 = pnand %p278_p5, %p272_p2 }
  0x2f   :  { %v118_v38 = vrot.slane %v108_v21, %v107_v14  ;;  %v122_v39 = vrot.slane %v112_v26, %v107_v14 }
  0x30   :  { %v145_v49 = vrot.slane %v135_v36, %v134_v24  ;;  %v149_v50 = vrot.slane %v139_v37, %v134_v24 }
  0x32   :  { %127 = vrot.lane.b32.xlu1 %v37_v1, %s304_s1  ;;  %125 = vrot.lane.b32.xlu0 %v36_v0, %s304_s1 }
  0x98   :  { %v99_v12 = vpop.permute.xlu1 %98  ;;  %v42_v13 = vpop.permute.xlu0 %41 }
  0x9c   :  { %v101_v22 = vpop.permute.xlu1 %100  ;;  %v44_v23 = vpop.permute.xlu0 %43 }
  0x9d   :  { %v48_v28 = vsel %vm47_vm0, %v42_v13, %v44_v23  ;;  %v49_v29 = vsel %vm47_vm0, %v44_v23, %v42_v13  ;;  %v103_v46 = vsel %vm102_vm2, %v99_v12, %v101_v22  ;;  %v104_v47 = vsel %vm102_vm2, %v101_v22, %v99_v12 }
  0x9e   :  { %v69_v30 = vmul.f32 %v356_v16, %v49_v29  ;;  %v70_v31 = vmul.f32 %v358_v17, %v48_v28  ;;  %v123_v56 = vmul.f32 %v118_v38, %v104_v47  ;;  %v124_v57 = vmul.f32 %v122_v39, %v103_v46 }
  0xa0   :  { %v74_v34 = vpop.permute.xlu1 %73  ;;  %v72_v35 = vpop.permute.xlu0 %71  ;;  %v152_v42 = vadd.f32 %v69_v30, %v39_v27  ;;  %v153_v43 = vadd.f32 %v70_v31, %v40_v20  ;;  %v156_v60 = vadd.f32 %v123_v56, %v39_v27  ;;  %v157_v61 = vadd.f32 %v124_v57, %v40_v20 }
  0xa1   :  { %v76_v40 = vsel %vm75_vm1, %v72_v35, %v74_v34  ;;  %v77_v41 = vsel %vm75_vm1, %v74_v34, %v72_v35 }
  0xa2   :  { %v96_v44 = vmul.f32 %v367_v32, %v76_v40  ;;  %v97_v45 = vmul.f32 %v369_v33, %v77_v41 }
  0xa4   :  { %v128_v48 = vpop.permute.xlu1 %127  ;;  %v126_v51 = vpop.permute.xlu0 %125  ;;  %v155_v52 = vadd.f32 %v153_v43, %v97_v45  ;;  %v154_v53 = vadd.f32 %v152_v42, %v96_v44 }
  0xa5   :  { %v130_v54 = vsel %vm129_vm3, %v126_v51, %v128_v48  ;;  %v131_v55 = vsel %vm129_vm3, %v128_v48, %v126_v51 }
  0xa6   :  { %162 = vrot.lane.b32.xlu1 %v155_v52, %s301_s4  ;;  %160 = vrot.lane.b32.xlu0 %v154_v53, %s301_s4  ;;  %v150_v58 = vmul.f32 %v145_v49, %v130_v54  ;;  %v151_v59 = vmul.f32 %v149_v50, %v131_v55 }
  0xa8   :  { %v159_v62 = vadd.f32 %v157_v61, %v151_v59  ;;  %v158_v63 = vadd.f32 %v156_v60, %v150_v58 }
  0xaa   :  { %170 = vrot.lane.b32.xlu1 %v155_v52, %s304_s1  ;;  %168 = vrot.lane.b32.xlu0 %v154_v53, %s304_s1 }
  0xae   :  { %180 = vrot.lane.b32.xlu1 %v159_v62, %s302_s5  ;;  %178 = vrot.lane.b32.xlu0 %v158_v63, %s302_s5 }
  0xb2   :  { %188 = vrot.lane.b32.xlu1 %v159_v62, %s303_s6  ;;  %186 = vrot.lane.b32.xlu0 %v158_v63, %s303_s6 }
 0x118   :  { %v163_v0 = vpop.permute.xlu1 %162  ;;  %v161_v1 = vpop.permute.xlu0 %160 }
 0x119   :  { %v164_v6 = vsel %vm102_vm2, %v161_v1, %v163_v0  ;;  %v165_v8 = vsel %vm102_vm2, %v163_v0, %v161_v1 }
 0x11a   :  { %v166_v13 = vmul.f32 %v165_v8, %v118_v38  ;;  %v167_v14 = vmul.f32 %v164_v6, %v122_v39 }
 0x11c   :  { %v171_v2 = vpop.permute.xlu1 %170  ;;  %v169_v3 = vpop.permute.xlu0 %168 }
 0x11d   :  { %v172_v4 = vsel %vm129_vm3, %v169_v3, %v171_v2  ;;  %v173_v5 = vsel %vm129_vm3, %v171_v2, %v169_v3 }
 0x11e   :  { %v174_v11 = vmul.f32 %v172_v4, %v145_v49  ;;  %v175_v12 = vmul.f32 %v173_v5, %v149_v50 }
 0x120   :  { %v181_v9 = vpop.permute.xlu1 %180  ;;  %v179_v10 = vpop.permute.xlu0 %178  ;;  %v176_v21 = vsub.f32 %v166_v13, %v174_v11  ;;  %v177_v22 = vsub.f32 %v167_v14, %v175_v12 }
 0x121   :  { %v182_v15 = vsel %vm47_vm0, %v179_v10, %v181_v9  ;;  %v183_v18 = vsel %vm47_vm0, %v181_v9, %v179_v10 }
 0x122   :  { %v184_v25 = vmul.f32 %v183_v18, %v356_v16  ;;  %v185_v26 = vmul.f32 %v182_v15, %v358_v17  ;;  %v196_v31 = vand.u32 2147483647, %v176_v21  ;;  %v197_v34 = vand.u32 2147483647, %v177_v22 }
 0x124   :  { %v189_v19 = vpop.permute.xlu1 %188  ;;  %v187_v20 = vpop.permute.xlu0 %186 }
 0x125   :  { %v190_v23 = vsel %vm75_vm1, %v187_v20, %v189_v19  ;;  %v191_v24 = vsel %vm75_vm1, %v189_v19, %v187_v20 }
 0x126   :  { %v192_v27 = vmul.f32 %v190_v23, %v367_v32  ;;  %v193_v28 = vmul.f32 %v191_v24, %v369_v33 }
 0x128   :  { %v194_v29 = vsub.f32 %v184_v25, %v192_v27  ;;  %v195_v30 = vsub.f32 %v185_v26, %v193_v28 }
 0x12a   :  { %v198_v35 = vand.u32 2147483647, %v194_v29  ;;  %v199_v36 = vand.u32 2147483647, %v195_v30 }
 0x12c   :  { %v200_v37 = vadd.f32 %v198_v35, %v196_v31  ;;  %v201_v38 = vadd.f32 %v199_v36, %v197_v34 }
 0x12e   :  { %202 = vst [vmem:[#allocation7] sm:$0xff] %v200_v37  ;;  %203 = vst [vmem:[#allocation7 + $0x8] sm:$0xff] %v201_v38 }
 0x12f   :  { %282 = shalt.err (!%p279_p6)
}
 0x130   :  { %s283_s12 = scalar_lea.hbm %s429_s2, 256 }
 0x131   :  { %p284_p7 = scmp.ne.s32.totalorder %s429_s2, %s283_s12  ;;  %p287_p8 = scmp.lt.u32.totalorder %s283_s12, %s429_s2 }
 0x133   :  { %p289_p9 = pnand %p287_p8, %p284_p7 }
 0x135   :  { %292 = shalt.err (!%p289_p9)
}
 0x136   :  { %213 = dma.vmem_to_hbm [thread:$0]  %s211_s8, 256, %s429_s2, [#allocation4]  }
 0x137   :  { %297 = dma.done.wait [#allocation4], 256  }
 0x138   :  { %298 = vsyncadd [#allocation4], 4294967040 }
 0x139   :  { %217 = vsyncpa [#allocation3], 1 }
 0x13a   :  { %218 = vsyncpa [#allocation6], 1 }
 0x13b   :  { %219 = vsyncpa [#allocation4], 1 }

</bundles_post_ra>
